<compile_context>
chip_gen: v6e
topology: v6e:2x2x1
jax: 0.10.0
libtpu: 0.0.40
codegen_flags: <defaults>
</compile_context>

<pallas_src>
import functools
import math

import jax
import jax.numpy as jnp
from jax.experimental import pallas as pl
from jax.experimental.pallas import tpu as pltpu

LANE = 128  # TPU lane width: output last dim padded to this (unmasked vst)


def _round_up(x, m):
    return ((x + m - 1) // m) * m


def gaussion_net_kernel(x_ref, w1_ref, b1_ref, w2_ref, b2_ref,
                        wh_ref, bh_ref, out_ref, *, n_action):
    """One batch tile of the fused Gaussion_Net forward.

    Matmuls run with (possibly bf16) operands and f32 accumulation on the MXU;
    all elementwise math stays f32 (v5e-safe: f32-only VPU/EUP).  Output cols:
      [0, n_action)            -> mu
      [n_action, 2*n_action)   -> sigma = exp(clip(., -5, 2))
      [2*n_action, LANE)       -> zero padding (weights/bias padded with 0)
    """
    cdt = w1_ref.dtype  # MXU operand dtype (bf16 or f32)

    # x arrives f32 from HBM; cast on the VPU right before the first dot.
    x = x_ref[...].astype(cdt)

    # hidden layer 1: Linear + ReLU
    h = jnp.dot(x, w1_ref[...], preferred_element_type=jnp.float32)
    h = jnp.maximum(h + b1_ref[...], 0.0)

    # hidden layer 2: Linear + ReLU
    h = jnp.dot(h.astype(cdt), w2_ref[...], preferred_element_type=jnp.float32)
    h = jnp.maximum(h + b2_ref[...], 0.0)

    # fused heads: one matmul producing [mu | sigma_logits | pad]
    y = jnp.dot(h.astype(cdt), wh_ref[...],
                preferred_element_type=jnp.float32) + bh_ref[...]

    # exp(clamp(., -5, 2)) applied only to the sigma columns (EUP slot ~free)
    col = jax.lax.broadcasted_iota(jnp.int32, y.shape, dimension=1)
    is_sigma = (col >= n_action) & (col < 2 * n_action)
    sigma = jnp.exp(jnp.clip(y, -5.0, 2.0))
    out_ref[...] = jnp.where(is_sigma, sigma, y).astype(out_ref.dtype)


def prepare_params(params, *, compute_dtype=jnp.bfloat16):
    """One-time parameter prep (call once, reuse across forward calls).

    Fuses mu/sigma heads into one zero-padded lane-dense (h2, 128) weight,
    casts MXU operands to compute_dtype, and reshapes biases to (1, out) f32.
    """
    h2, n_action = params["wmu"].shape
    padded = _round_up(2 * n_action, LANE)

    w_head = jnp.zeros((h2, padded), jnp.float32)
    w_head = w_head.at[:, :n_action].set(params["wmu"])
    w_head = w_head.at[:, n_action:2 * n_action].set(params["wsigma"])
    b_head = jnp.zeros((1, padded), jnp.float32)
    b_head = b_head.at[:, :n_action].set(params["bmu"].reshape(1, -1))
    b_head = b_head.at[:, n_action:2 * n_action].set(
        params["bsigma"].reshape(1, -1))

    return {
        "w1": params["w1"].astype(compute_dtype),
        "b1": params["b1"].reshape(1, -1).astype(jnp.float32),
        "w2": params["w2"].astype(compute_dtype),
        "b2": params["b2"].reshape(1, -1).astype(jnp.float32),
        "w_head": w_head.astype(compute_dtype),
        "b_head": b_head.astype(jnp.float32),
        "n_action": int(n_action),
        "padded": int(padded),
    }


def gaussion_net_forward(x, prepped, *, out_dtype=jnp.bfloat16,
                         batch_tile=4096):
    """x: (batch, n_state) float32; prepped: output of prepare_params().

    Returns (mu, sigma), each (batch, n_action) in out_dtype.
    """
    batch, n_state = x.shape
    n_action = prepped["n_action"]
    padded = prepped["padded"]

    # Batch tile: large (amortize per-step overhead), multiple of 8, and when
    # the batch is big enough keep >= 2 grid steps so v7x's two TensorCores
    # both get work (the batch axis is "parallel").
    batch_tile = max(8, _round_up(int(batch_tile), 8))
    if batch >= 16:
        tb = min(batch_tile, _round_up(pl.cdiv(batch, 2), 8))
    else:
        tb = batch  # tiny batch: single step, block == full array extent
    grid = (pl.cdiv(batch, tb),)

    # Weights/biases stay VMEM-resident across grid steps (constant index_map).
    # NOTE: they total only a few KB, so the default double-buffer copy is
    # negligible; pipeline_mode=pl.Buffered(1) would reclaim it if tb grows.
    resident = lambda a: pl.BlockSpec(a.shape, lambda i: (0,) * a.ndim)

    out = pl.pallas_call(
        functools.partial(gaussion_net_kernel, n_action=n_action),
        out_shape=jax.ShapeDtypeStruct((batch, padded), out_dtype),
        grid=grid,
        in_specs=[
            pl.BlockSpec((tb, n_state), lambda i: (i, 0)),  # x: tiled on batch
            resident(prepped["w1"]), resident(prepped["b1"]),
            resident(prepped["w2"]), resident(prepped["b2"]),
            resident(prepped["w_head"]), resident(prepped["b_head"]),
        ],
        out_specs=pl.BlockSpec((tb, padded), lambda i: (i, 0)),
        compiler_params=pltpu.CompilerParams(
            dimension_semantics=("parallel",)),
    )(x, prepped["w1"], prepped["b1"], prepped["w2"], prepped["b2"],
      prepped["w_head"], prepped["b_head"])

    # Single pass over the padded slab; mu/sigma split off the small result.
    real = out[:, :2 * n_action]
    mu = real[:, :n_action]
    sigma = real[:, n_action:]
    return mu, sigma


def kaiming_normal(key, fan_in, fan_out):
    """kaiming_normal_(mode='fan_in', nonlinearity='leaky_relu') with default
    negative_slope=0.01; weight returned in (in, out) layout."""
    gain = math.sqrt(2.0 / (1.0 + 0.01 ** 2))
    std = gain / math.sqrt(fan_in)
    return std * jax.random.normal(key, (fan_in, fan_out), dtype=jnp.float32)


def init_params(key, n_state, n_action, hidden_sizes):
    ks = jax.random.split(key, 4)
    h1, h2 = hidden_sizes
    return {
        "w1": kaiming_normal(ks[0], n_state, h1),
        "b1": jnp.zeros((1, h1), jnp.float32),
        "w2": kaiming_normal(ks[1], h1, h2),
        "b2": jnp.zeros((1, h2), jnp.float32),
        "wmu": kaiming_normal(ks[2], h2, n_action),
        "bmu": jnp.zeros((1, n_action), jnp.float32),
        "wsigma": kaiming_normal(ks[3], h2, n_action),
        "bsigma": jnp.zeros((1, n_action), jnp.float32),
    }


def reference_forward(x, p):
    h = jnp.maximum(x @ p["w1"] + p["b1"], 0.0)
    h = jnp.maximum(h @ p["w2"] + p["b2"], 0.0)
    mu = h @ p["wmu"] + p["bmu"]
    sigma = jnp.exp(jnp.clip(h @ p["wsigma"] + p["bsigma"], -5.0, 2.0))
    return mu, sigma


if __name__ == "__main__":
    n_state, n_action = 8, 4
    hidden_sizes = (32, 32)
    batch = 8

    key = jax.random.PRNGKey(0)
    kx, kp = jax.random.split(key)
    x = jax.random.normal(kx, (batch, n_state), dtype=jnp.float32)
    params = init_params(kp, n_state, n_action, hidden_sizes)

    mu_ref, sigma_ref = reference_forward(x, params)

    # Fast path: bf16 MXU operands, bf16 output slab (loose tolerance vs f32).
    prepped = prepare_params(params)          # one-time prep, reused per call
    mu, sigma = gaussion_net_forward(x, prepped)
    jax.block_until_ready((mu, sigma))
    assert mu.shape == (batch, n_action) and sigma.shape == (batch, n_action)
    assert jnp.allclose(mu.astype(jnp.float32), mu_ref,
                        atol=1e-1, rtol=1e-1), "mu (bf16) mismatch"
    assert jnp.allclose(sigma.astype(jnp.float32), sigma_ref,
                        atol=1e-1, rtol=1e-1), "sigma (bf16) mismatch"
    assert bool(jnp.all(sigma > 0))

    # Exact path: f32 operands + f32 output must match the reference tightly.
    prepped32 = prepare_params(params, compute_dtype=jnp.float32)
    mu32, sigma32 = gaussion_net_forward(x, prepped32, out_dtype=jnp.float32)
    jax.block_until_ready((mu32, sigma32))
    assert jnp.allclose(mu32, mu_ref, atol=1e-5, rtol=1e-5), "mu (f32) mismatch"
    assert jnp.allclose(sigma32, sigma_ref, atol=1e-5, rtol=1e-5), "sigma (f32) mismatch"

    # Larger batch exercises the multi-step parallel grid (>= 2 steps so both
    # v7x TensorCores participate; on v5e/v6e it just pipelines x/out DMAs).
    big = 4096
    xb = jax.random.normal(kx, (big, n_state), dtype=jnp.float32)
    mub_ref, sigb_ref = reference_forward(xb, params)
    mub, sigb = gaussion_net_forward(xb, prepped)
    jax.block_until_ready((mub, sigb))
    assert mub.shape == (big, n_action) and sigb.shape == (big, n_action)
    assert jnp.allclose(mub.astype(jnp.float32), mub_ref,
                        atol=1e-1, rtol=1e-1), "mu (big batch) mismatch"
    assert jnp.allclose(sigb.astype(jnp.float32), sigb_ref,
                        atol=1e-1, rtol=1e-1), "sigma (big batch) mismatch"

    print("KERNEL_OK")
</pallas_src>

<mosaic_0001>
module attributes {stable_mosaic.version = 11 : i64} {
  func.func @gaussion_net_kernel(%arg0: i32, %arg1: memref<8x8xf32, #tpu.memory_space<vmem>>, %arg2: memref<8x32xbf16, #tpu.memory_space<vmem>>, %arg3: memref<1x32xf32, #tpu.memory_space<vmem>>, %arg4: memref<32x32xbf16, #tpu.memory_space<vmem>>, %arg5: memref<1x32xf32, #tpu.memory_space<vmem>>, %arg6: memref<32x128xbf16, #tpu.memory_space<vmem>>, %arg7: memref<1x128xf32, #tpu.memory_space<vmem>>, %arg8: memref<8x128xbf16, #tpu.memory_space<vmem>>) attributes {dimension_semantics = [#tpu.dimension_semantics<parallel>], iteration_bounds = array<i64: 1>, scalar_prefetch = 0 : i64, scratch_operands = 0 : i64, tpu.core_type = #tpu.core_type<tc>, window_params = [{transform_indices = @transform_0, window_bounds = array<i64: 8, 8>}, {pipeline_mode = #tpu.pipeline_mode<synchronous>, transform_indices = @transform_1, window_bounds = array<i64: 8, 32>}, {pipeline_mode = #tpu.pipeline_mode<synchronous>, transform_indices = @transform_2, window_bounds = array<i64: 1, 32>}, {pipeline_mode = #tpu.pipeline_mode<synchronous>, transform_indices = @transform_3, window_bounds = array<i64: 32, 32>}, {pipeline_mode = #tpu.pipeline_mode<synchronous>, transform_indices = @transform_4, window_bounds = array<i64: 1, 32>}, {pipeline_mode = #tpu.pipeline_mode<synchronous>, transform_indices = @transform_5, window_bounds = array<i64: 32, 128>}, {pipeline_mode = #tpu.pipeline_mode<synchronous>, transform_indices = @transform_6, window_bounds = array<i64: 1, 128>}, {transform_indices = @transform_7, window_bounds = array<i64: 8, 128>}]} {
    %c0 = arith.constant 0 : index
    %c0_0 = arith.constant 0 : index
    %0 = vector.load %arg1[%c0, %c0_0] : memref<8x8xf32, #tpu.memory_space<vmem>>, vector<8x8xf32>
    %1 = arith.truncf %0 : vector<8x8xf32> to vector<8x8xbf16>
    %c0_1 = arith.constant 0 : index
    %c0_2 = arith.constant 0 : index
    %2 = vector.load %arg2[%c0_1, %c0_2] : memref<8x32xbf16, #tpu.memory_space<vmem>>, vector<8x32xbf16>
    %cst = arith.constant dense<0.000000e+00> : vector<8x32xf32>
    %3 = tpu.matmul %1, %2, %cst {dimension_numbers = #tpu.dot_dimension_numbers<[1], [0], [0], [1], [0, 0, 1, 1], [], []>} : vector<8x8xbf16>, vector<8x32xbf16>, vector<8x32xf32> -> vector<8x32xf32>
    %c0_3 = arith.constant 0 : index
    %c0_4 = arith.constant 0 : index
    %4 = vector.load %arg3[%c0_3, %c0_4] : memref<1x32xf32, #tpu.memory_space<vmem>>, vector<1x32xf32>
    %5 = vector.broadcast %4 : vector<1x32xf32> to vector<8x32xf32>
    %6 = arith.addf %3, %5 : vector<8x32xf32>
    %cst_5 = arith.constant 0.000000e+00 : f32
    %7 = vector.broadcast %cst_5 : f32 to vector<8x32xf32>
    %8 = arith.maximumf %6, %7 : vector<8x32xf32>
    %9 = arith.truncf %8 : vector<8x32xf32> to vector<8x32xbf16>
    %c0_6 = arith.constant 0 : index
    %c0_7 = arith.constant 0 : index
    %10 = vector.load %arg4[%c0_6, %c0_7] : memref<32x32xbf16, #tpu.memory_space<vmem>>, vector<32x32xbf16>
    %cst_8 = arith.constant dense<0.000000e+00> : vector<8x32xf32>
    %11 = tpu.matmul %9, %10, %cst_8 {dimension_numbers = #tpu.dot_dimension_numbers<[1], [0], [0], [1], [0, 0, 1, 1], [], []>} : vector<8x32xbf16>, vector<32x32xbf16>, vector<8x32xf32> -> vector<8x32xf32>
    %c0_9 = arith.constant 0 : index
    %c0_10 = arith.constant 0 : index
    %12 = vector.load %arg5[%c0_9, %c0_10] : memref<1x32xf32, #tpu.memory_space<vmem>>, vector<1x32xf32>
    %13 = vector.broadcast %12 : vector<1x32xf32> to vector<8x32xf32>
    %14 = arith.addf %11, %13 : vector<8x32xf32>
    %cst_11 = arith.constant 0.000000e+00 : f32
    %15 = vector.broadcast %cst_11 : f32 to vector<8x32xf32>
    %16 = arith.maximumf %14, %15 : vector<8x32xf32>
    %17 = arith.truncf %16 : vector<8x32xf32> to vector<8x32xbf16>
    %c0_12 = arith.constant 0 : index
    %c0_13 = arith.constant 0 : index
    %18 = vector.load %arg6[%c0_12, %c0_13] : memref<32x128xbf16, #tpu.memory_space<vmem>>, vector<32x128xbf16>
    %cst_14 = arith.constant dense<0.000000e+00> : vector<8x128xf32>
    %19 = tpu.matmul %17, %18, %cst_14 {dimension_numbers = #tpu.dot_dimension_numbers<[1], [0], [0], [1], [0, 0, 1, 1], [], []>} : vector<8x32xbf16>, vector<32x128xbf16>, vector<8x128xf32> -> vector<8x128xf32>
    %c0_15 = arith.constant 0 : index
    %c0_16 = arith.constant 0 : index
    %20 = vector.load %arg7[%c0_15, %c0_16] : memref<1x128xf32, #tpu.memory_space<vmem>>, vector<1x128xf32>
    %21 = vector.broadcast %20 : vector<1x128xf32> to vector<8x128xf32>
    %22 = arith.addf %19, %21 : vector<8x128xf32>
    %23 = tpu.iota {dimensions = array<i32: 1>} : vector<8x128xi32>
    %c4_i32 = arith.constant 4 : i32
    %24 = vector.broadcast %c4_i32 : i32 to vector<8x128xi32>
    %25 = arith.cmpi sge, %23, %24 : vector<8x128xi32>
    %c8_i32 = arith.constant 8 : i32
    %26 = vector.broadcast %c8_i32 : i32 to vector<8x128xi32>
    %27 = arith.cmpi slt, %23, %26 : vector<8x128xi32>
    %28 = arith.andi %25, %27 : vector<8x128xi1>
    %cst_17 = arith.constant -5.000000e+00 : f32
    %cst_18 = arith.constant 2.000000e+00 : f32
    %29 = vector.broadcast %cst_17 : f32 to vector<8x128xf32>
    %30 = arith.maximumf %29, %22 : vector<8x128xf32>
    %31 = vector.broadcast %cst_18 : f32 to vector<8x128xf32>
    %32 = arith.minimumf %31, %30 : vector<8x128xf32>
    %33 = math.exp %32 : vector<8x128xf32>
    %34 = arith.select %28, %33, %22 : vector<8x128xi1>, vector<8x128xf32>
    %35 = arith.truncf %34 : vector<8x128xf32> to vector<8x128xbf16>
    %c0_19 = arith.constant 0 : index
    %c0_20 = arith.constant 0 : index
    %36 = vector.load %arg8[%c0_19, %c0_20] : memref<8x128xbf16, #tpu.memory_space<vmem>>, vector<8x128xbf16>
    tpu.vector_store %arg8[%c0_19, %c0_20], %35 {strides = array<i32>} : memref<8x128xbf16, #tpu.memory_space<vmem>>, vector<8x128xbf16>,
    return
  }
  func.func @transform_0(%arg0: i32) -> (i32, i32) {
    %c0_i32 = arith.constant 0 : i32
    %c0_i32_0 = arith.constant 0 : i32
    return %arg0, %c0_i32 : i32, i32
  }
  func.func @transform_1(%arg0: i32) -> (i32, i32) {
    %c0_i32 = arith.constant 0 : i32
    %c0_i32_0 = arith.constant 0 : i32
    %c0_i32_1 = arith.constant 0 : i32
    return %c0_i32, %c0_i32_0 : i32, i32
  }
  func.func @transform_2(%arg0: i32) -> (i32, i32) {
    %c0_i32 = arith.constant 0 : i32
    %c0_i32_0 = arith.constant 0 : i32
    %c0_i32_1 = arith.constant 0 : i32
    return %c0_i32, %c0_i32_0 : i32, i32
  }
  func.func @transform_3(%arg0: i32) -> (i32, i32) {
    %c0_i32 = arith.constant 0 : i32
    %c0_i32_0 = arith.constant 0 : i32
    %c0_i32_1 = arith.constant 0 : i32
    return %c0_i32, %c0_i32_0 : i32, i32
  }
  func.func @transform_4(%arg0: i32) -> (i32, i32) {
    %c0_i32 = arith.constant 0 : i32
    %c0_i32_0 = arith.constant 0 : i32
    %c0_i32_1 = arith.constant 0 : i32
    return %c0_i32, %c0_i32_0 : i32, i32
  }
  func.func @transform_5(%arg0: i32) -> (i32, i32) {
    %c0_i32 = arith.constant 0 : i32
    %c0_i32_0 = arith.constant 0 : i32
    %c0_i32_1 = arith.constant 0 : i32
    return %c0_i32, %c0_i32_0 : i32, i32
  }
  func.func @transform_6(%arg0: i32) -> (i32, i32) {
    %c0_i32 = arith.constant 0 : i32
    %c0_i32_0 = arith.constant 0 : i32
    %c0_i32_1 = arith.constant 0 : i32
    return %c0_i32, %c0_i32_0 : i32, i32
  }
  func.func @transform_7(%arg0: i32) -> (i32, i32) {
    %c0_i32 = arith.constant 0 : i32
    %c0_i32_0 = arith.constant 0 : i32
    return %arg0, %c0_i32 : i32, i32
  }
}

</mosaic_0001>

<bundles_post_ra>
// kernel: tpu_custom_call.1
= control target key start
LH: loop header
LB: loop body
LE: loop exit
PB: predicated region body
PF: predicated region fallthrough
CT: control target
= control target key end

     0   :  { %12 = vsyncpa [#allocation3], 0  ;;  %s539_s0 = inlined_call_operand.hbm [shape: f32[8,8], index: 0, kind: input, shape index: {}]   ;;  %s540_s1 = inlined_call_operand.hbm [shape: bf16[8,32], index: 1, kind: input, shape index: {}]   ;;  %s541_s2 = inlined_call_operand.vmem [shape: f32[1,32], index: 2, kind: input, shape index: {}]   ;;  %s542_s3 = inlined_call_operand.hbm [shape: bf16[32,32], index: 3, kind: input, shape index: {}]   ;;  %s543_s4 = inlined_call_operand.vmem [shape: f32[1,32], index: 4, kind: input, shape index: {}]   ;;  %s544_s5 = inlined_call_operand.hbm [shape: bf16[32,128], index: 5, kind: input, shape index: {}]   ;;  %s545_s6 = inlined_call_operand.vmem [shape: f32[1,128], index: 6, kind: input, shape index: {}]   ;;  %s546_s7 = inlined_call_operand.hbm [shape: bf16[8,128], index: 7, kind: output, shape index: {}]  }
   0x1   :  { %13 = vsyncpa [#allocation6], 0 }
   0x2   :  { %14 = vsyncpa [#allocation9], 0 }
   0x3   :  { %15 = vsyncpa [#allocation4], 0  ;;  %s466_s24 = smov [#allocation5]   ;;  %s467_s26 = smov [#allocation2]  }
   0x4   :  { %s32_s25 = sshll.u32 %s466_s24, 4  ;;  %s22_s27 = sshll.u32 %s467_s26, 4  ;;  %s33_s25 = int_to_ptr.vmem [resolvable:$true] %s32_s25  ;;  %s23_s27 = int_to_ptr.vmem [resolvable:$true] %s22_s27 }
   0x5   :  { %s366_s28 = scalar_lea.vmem %s33_s25, 64  ;;  %p371_p1 = scmp.lt.s32.totalorder %s33_s25, %s33_s25 }
   0x6   :  { %p367_p0 = scmp.ne.s32.totalorder %s33_s25, %s366_s28  ;;  %p372_p2 = scmp.lt.s32.totalorder %s366_s28, %s366_s28 }
   0x8   :  { %p373_p3 = por %p372_p2, %p371_p1 }
   0xa   :  { %p374_p4 = pnand %p373_p3, %p367_p0 }
   0xc   :  { %377 = shalt.err (!%p374_p4)
}
   0xd   :  { %35 = dma.hbm_to_vmem [thread:$0]  %s540_s1, 64, %s33_s25, [#allocation6]  }
   0xe   :  { %s386_s8 = scalar_lea.vmem %s23_s27, 128  ;;  %p391_p6 = scmp.lt.s32.totalorder %s23_s27, %s23_s27 }
   0xf   :  { %p387_p5 = scmp.ne.s32.totalorder %s23_s27, %s386_s8  ;;  %p392_p7 = scmp.lt.s32.totalorder %s386_s8, %s386_s8 }
  0x11   :  { %p393_p8 = por %p392_p7, %p391_p6 }
  0x13   :  { %p394_p9 = pnand %p393_p8, %p387_p5 }
  0x15   :  { %397 = shalt.err (!%p394_p9)
}
  0x16   :  { %25 = dma.hbm_to_vmem [thread:$0]  %s539_s0, 128, %s23_s27, [#allocation3]  }
  0x17   :  { %s468_s11 = smov [#allocation7]  }
  0x18   :  { %s43_s12 = sshll.u32 %s468_s11, 4  ;;  %s44_s12 = int_to_ptr.vmem [resolvable:$true] %s43_s12 }
  0x19   :  { %s406_s13 = scalar_lea.vmem %s44_s12, 256  ;;  %p411_p11 = scmp.lt.s32.totalorder %s44_s12, %s44_s12 }
  0x1a   :  { %p407_p10 = scmp.ne.s32.totalorder %s44_s12, %s406_s13  ;;  %p412_p12 = scmp.lt.s32.totalorder %s406_s13, %s406_s13 }
  0x1c   :  { %p413_p13 = por %p412_p12, %p411_p11 }
  0x1e   :  { %p414_p0 = pnand %p413_p13, %p407_p10 }
  0x20   :  { %417 = shalt.err (!%p414_p0)
}
  0x21   :  { %s469_s1 = smov 64   ;;  %s470_s14 = smov 4  }
  0x22   :  { %49 = dma.hbm_to_vmem [thread:$0]  %s542_s3, 256, %s44_s12, [#allocation6], %s469_s1, %s469_s1, %s470_s14  }
  0x23   :  { %s471_s17 = smov [#allocation8]  }
  0x24   :  { %s57_s18 = sshll.u32 %s471_s17, 4  ;;  %s58_s18 = int_to_ptr.vmem [resolvable:$true] %s57_s18 }
  0x25   :  { %s426_s0 = scalar_lea.vmem %s58_s18, 256  ;;  %p431_p2 = scmp.lt.s32.totalorder %s58_s18, %s58_s18 }
  0x26   :  { %p427_p1 = scmp.ne.s32.totalorder %s58_s18, %s426_s0  ;;  %p432_p3 = scmp.lt.s32.totalorder %s426_s0, %s426_s0 }
  0x28   :  { %p433_p4 = por %p432_p3, %p431_p2 }
  0x2a   :  { %p434_p5 = pnand %p433_p4, %p427_p1 }
  0x2c   :  { %437 = shalt.err (!%p434_p5)
}
  0x2d   :  { %63 = dma.hbm_to_vmem [thread:$0]  %s544_s5, 256, %s58_s18, [#allocation9], %s469_s1, %s469_s1, %s470_s14  }
  0x2e   :  { %458 = dma.done.wait [#allocation3], 128  }
  0x2f   :  { %459 = vsyncadd [#allocation3], 4294967168 }
  0x30   :  { %460 = dma.done.wait [#allocation6], 320  }
  0x31   :  { %461 = vsyncadd [#allocation6], 4294966976 }
  0x32   :  { %462 = dma.done.wait [#allocation9], 256  }
  0x33   :  { %463 = vsyncadd [#allocation9], 4294967040  ;;  %v472_v0 = vmov 0.0   ;;  %vm473_vm0 = vmmov 0   ;;  %vm93_vm1 = vcmask 1043456   ;;  %v79_v2 = vld [vmem:[#allocation2] sm:$0xff]  ;;  %v274_v34 = vlaneseq }
  0x34   :  { %321 = vmatprep.subr.bf16.mxu0 %v472_v0  ;;  %323 = vmatprep.mubr.msk.bf16.mxu0 %vm473_vm0, %v472_v0  ;;  %v81_v1 = vld [vmem:[#allocation5] sm:$0xf]  ;;  %v80_v4 = vpack.c.bf16 %v79_v2, %v79_v2  ;;  %vm89_vm2 = vcmask 64512   ;;  %v352_v5 = vld [vmem:[#allocation7 + $0x8] sm:$0xff]   ;;  %v353_v6 = vld [vmem:[#allocation7] sm:$0xff]   ;;  %vm162_vm3 = vcmask 261120  }
  0x35   :  { %327 = vmatprep.subr.bf16.mxu1 %v472_v0  ;;  %331 = vmatprep.mubr.msk.bf16.mxu1 %vm473_vm0, %v472_v0  ;;  %v95_v3 = vsel %vm93_vm1, %v81_v1, 0  ;;  %v354_v7 = vld [vmem:[#allocation8 + $0x8] sm:$0xff]   ;;  %v303_v8 = vld [vmem:[%s541_s2] ss:$0 sm:$0xff]  ;;  %v275_v35 = vand.u32 127, %v274_v34 }
  0x36   :  { %322 = vmatpush3.bf16.msra.mxu0 %v95_v3  ;;  %328 = vmatpush3.bf16.msra.mxu1 %v352_v5  ;;  %v355_v16 = vld [vmem:[#allocation8] sm:$0xff]  }
  0x37   :  { %335 = vmatprep.subr.bf16.mxu0 %v472_v0  ;;  %329 = vmatprep.subr.bf16.mxu1 %v472_v0  ;;  %v305_v17 = vld [vmem:[%s543_s4] ss:$0 sm:$0xff]  ;;  %vm276_vm4 = vcmp.ge.s32.totalorder %v275_v35, 4  ;;  %vm277_vm5 = vcmp.lt.s32.totalorder %v275_v35, 8  ;;  %s474_s4 = smov [#allocation10]  }
  0x38   :  { %v309_v25 = vld [vmem:[%s545_s6] ss:$0 sm:$0xff]  ;;  %vm278_vm6 = vmand %vm276_vm4, %vm277_vm5  ;;  %s292_s24 = sshll.u32 %s474_s4, 4  ;;  %s293_s24 = int_to_ptr.vmem [resolvable:$true] %s292_s24 }
  0x39   :  { %324 = vmatmul.mubr.msk.bf16.vlgmr.msra.gmra.mxu0 %vm89_vm2, %v80_v4  ;;  %s438_s6 = scalar_lea.vmem %s293_s24, 64  ;;  %p443_p7 = scmp.lt.s32.totalorder %s293_s24, %s293_s24 }
  0x3a   :  { %339 = vmatprep.mubr.msk.bf16.mxu0 %vm473_vm0, %v472_v0  ;;  %330 = vmatpush3.bf16.msra.mxu1 %v353_v6  ;;  %p439_p6 = scmp.ne.s32.totalorder %s293_s24, %s438_s6  ;;  %p444_p8 = scmp.lt.s32.totalorder %s438_s6, %s438_s6 }
  0x3b   :  { %336 = vmatpush3.bf16.msra.mxu0 %v354_v7 }
  0x3c   :  { %337 = vmatprep.subr.bf16.mxu0 %v472_v0  ;;  %p445_p9 = por %p444_p8, %p443_p7 }
  0x3e   :  { %p446_p10 = pnand %p445_p9, %p439_p6 }
  0x3f   :  { %338 = vmatpush3.bf16.msra.mxu0 %v355_v16 }
  0xf9   :  { %v131_v9 = vpop.f32.mrf.mxu0 }
  0xfa   :  { %v132_v10 = vadd.f32 %v303_v8, %v131_v9 }
  0xfb   :  { %v325_v11 = vpop.f32.mrf.mxu0 }
  0xfc   :  { %v137_v12 = vmax.f32 %v132_v10, 0.0 }
  0xfd   :  { %v134_v13 = vpop.f32.mrf.mxu0 }
  0xfe   :  { %v138_v14 = vpack.c.bf16 %v137_v12, %v137_v12 }
  0xff   :  { %v326_v15 = vpop.f32.mrf.mxu0 }
 0x100   :  { %332 = vmatmul.mubr.msk.bf16.vlgmr.msra.gmra.mxu1 %vm162_vm3, %v138_v14 }
 0x1c0   :  { %v200_v18 = vpop.f32.mrf.mxu1 }
 0x1c1   :  { %v201_v19 = vadd.f32 %v305_v17, %v200_v18 }
 0x1c2   :  { %v333_v20 = vpop.f32.mrf.mxu1 }
 0x1c3   :  { %v206_v21 = vmax.f32 %v201_v19, 0.0 }
 0x1c4   :  { %v203_v22 = vpop.f32.mrf.mxu1 }
 0x1c5   :  { %v207_v23 = vpack.c.bf16 %v206_v21, %v206_v21 }
 0x1c6   :  { %v334_v24 = vpop.f32.mrf.mxu1 }
 0x1c7   :  { %340 = vmatmul.mubr.msk.bf16.vlgmr.msra.gmra.mxu0 %vm162_vm3, %v207_v23 }
 0x287   :  { %v268_v26 = vpop.f32.mrf.mxu0 }
 0x288   :  { %v269_v27 = vadd.f32 %v309_v25, %v268_v26 }
 0x289   :  { %v341_v28 = vpop.f32.mrf.mxu0 }
 0x28a   :  { %v279_v29 = vmax.f32 %v269_v27, -5.0 }
 0x28b   :  { %v271_v30 = vpop.f32.mrf.mxu0 }
 0x28c   :  { %v280_v31 = vmin.f32 %v279_v29, 2.0 }
 0x28d   :  { %v342_v32 = vpop.f32.mrf.mxu0 }
 0x28e   :  { %v281_v33 = vmul.f32 1.442695, %v280_v31 }
 0x290   :  { %356 = vpow2.f32 %v281_v33 }
 0x29d   :  { %v357_v36 = vpop.eup %356 }
 0x29e   :  { %v283_v37 = vsel %vm278_vm6, %v357_v36, %v269_v27 }
 0x29f   :  { %v284_v38 = vpack.c.bf16 %v283_v37, %v283_v37 }
 0x2a1   :  { %285 = vst [vmem:[#allocation10] sm:$0xf] %v284_v38 }
 0x2a2   :  { %449 = shalt.err (!%p446_p10)
}
 0x2a3   :  { %295 = dma.vmem_to_hbm [thread:$0]  %s293_s24, 64, %s546_s7, [#allocation4]  }
 0x2a4   :  { %464 = dma.done.wait [#allocation4], 64  }
 0x2a5   :  { %465 = vsyncadd [#allocation4], 4294967232 }
 0x2a6   :  { %299 = vsyncpa [#allocation3], 1 }
 0x2a7   :  { %300 = vsyncpa [#allocation6], 1 }
 0x2a8   :  { %301 = vsyncpa [#allocation9], 1 }
 0x2a9   :  { %302 = vsyncpa [#allocation4], 1 }

</bundles_post_ra>
